<compile_context>
chip_gen: v7x
topology: tpu7x:2x2x1
jax: 0.10.0
libtpu: 0.0.40
codegen_flags: <defaults>
</compile_context>

<pallas_src>
import functools

import jax
import jax.numpy as jnp
from jax.experimental import pallas as pl
from jax.experimental.pallas import tpu as pltpu


def _gat2_kernel(x_ref, w1e_ref, b1_ref, w2e_ref, b2_ref,
                 maskb_ref, maskt_ref, repm_ref, onesbd_ref, blkm_ref,
                 out_ref, *, n, heads, hid, n_cls, out_pad, neg_slope=0.2):
    """Fused 2-layer GAT forward, fully resident in VMEM (small graph).

    x_ref:      [N, F_in]
    w1e_ref:    [F_in, H*hid + 2H]   (= [W1 | W1·a_src1 | W1·a_dst1])
    b1_ref:     [1, H*hid]
    w2e_ref:    [H*hid, n_cls + 2]   (= [W2 | W2·a_src2 | W2·a_dst2])
    b2_ref:     [1, n_cls]
    maskb_ref:  [N, N]      additive mask (0 edge, -1e30 no edge), layer 2
    maskt_ref:  [N, H*N]    the same mask tiled per head along lanes, layer 1
    repm_ref:   [H, H*N]    repm[h, h*N+j] = 1   (per-head lane broadcast)
    onesbd_ref: [H*N, H]    onesbd[h*N+j, h] = 1 (per-head lane-block sums)
    blkm_ref:   [H*N, H*C]  block-diagonal 0/1 selector for the aggregation
    out_ref:    [N, out_pad] lane-dense padded log-softmax output
    """
    N, H, C = n, heads, hid

    # ---------------- layer 1: GATConv(heads=H, concat=True) ----------------
    x = x_ref[...]
    proj1 = jnp.dot(x, w1e_ref[...], preferred_element_type=jnp.float32)
    xw1 = proj1[:, :H * C]                            # [N, H*C]
    a_s1 = proj1[:, H * C:H * C + H]                  # [N, H]  alpha_src
    a_d1 = proj1[:, H * C + H:H * C + 2 * H]          # [N, H]  alpha_dst

    repm = repm_ref[...]                              # [H, H*N]

    # alpha_dst broadcast per head across src-lane blocks (idle MXU slot).
    a_d1_rep = jnp.dot(a_d1, repm, preferred_element_type=jnp.float32)  # [N, H*N]

    # alpha_src flattened head-major into one [1, H*N] lane row (tiny, once).
    a_s1_t = a_s1.T                                   # [H, N]
    a_s1_flat = jnp.concatenate(
        [a_s1_t[h:h + 1, :] for h in range(H)], axis=1)  # [1, H*N]

    # Single lane-batched attention block: one leaky_relu / mask add / exp.
    e = a_d1_rep + a_s1_flat                          # [N, H*N]
    e = jnp.where(e > 0.0, e, neg_slope * e)
    e = e + maskt_ref[...]

    # Per-(row, head) shift >= the masked per-head max (softmax is
    # shift-invariant): c = leaky_relu(a_dst + max_src a_src), so exp() never
    # overflows and no cross-lane segmented max is needed.
    a_s1_max = jnp.max(a_s1, axis=0, keepdims=True)   # [1, H]  (sublane max)
    c = a_d1 + a_s1_max                               # [N, H]
    c = jnp.where(c > 0.0, c, neg_slope * c)
    c_rep = jnp.dot(c, repm, preferred_element_type=jnp.float32)        # [N, H*N]

    p = jnp.exp(e - c_rep)                            # masked lanes -> 0

    # Per-head softmax denominators on the MXU: [N, H*N] @ [H*N, H] -> [N, H].
    denom = jnp.dot(p, onesbd_ref[...], preferred_element_type=jnp.float32)
    recip = pl.reciprocal(jnp.maximum(denom, 1e-30), approx=False)      # exact
    recip_rep = jnp.dot(recip, repm, preferred_element_type=jnp.float32)
    attn = p * recip_rep                              # [N, H*N]

    # All H per-head aggregations as ONE MXU matmul via a block-diagonal copy
    # of xw1 (selector mask precomputed, no in-kernel iota/divide/compare).
    xw_tiled = jnp.concatenate([xw1] * H, axis=0)     # [H*N, H*C]
    xw_blk = xw_tiled * blkm_ref[...]
    h1 = jnp.dot(attn, xw_blk, preferred_element_type=jnp.float32)      # [N, H*C]
    h1 = jnp.maximum(h1 + b1_ref[...], 0.0)           # bias + relu

    # --------------- layer 2: GATConv(heads=1, concat=False) ----------------
    proj2 = jnp.dot(h1, w2e_ref[...], preferred_element_type=jnp.float32)
    xw2 = proj2[:, :n_cls]                            # [N, n_cls]
    a_s2 = proj2[:, n_cls:n_cls + 1]                  # [N, 1]
    a_d2 = proj2[:, n_cls + 1:n_cls + 2]              # [N, 1]

    e2 = a_d2 + a_s2.T
    e2 = jnp.where(e2 > 0.0, e2, neg_slope * e2)
    e2 = e2 + maskb_ref[...]
    e2_max = jnp.max(e2, axis=1, keepdims=True)
    p2 = jnp.exp(e2 - e2_max)
    den2 = jnp.maximum(jnp.sum(p2, axis=1, keepdims=True), 1e-30)
    attn2 = p2 * pl.reciprocal(den2, approx=False)
    out2 = jnp.dot(attn2, xw2, preferred_element_type=jnp.float32) + b2_ref[...]

    # log_softmax over the class dimension
    m = jnp.max(out2, axis=1, keepdims=True)
    z = out2 - m
    lse = jnp.log(jnp.sum(jnp.exp(z), axis=1, keepdims=True))
    logp = z - lse                                    # [N, n_cls]

    # Lane-dense store: pad to out_pad lanes (unmasked vst), slice outside.
    out_ref[...] = jnp.concatenate(
        [logp, jnp.zeros((N, out_pad - n_cls), jnp.float32)], axis=1)


# --------------------------- one-time setup path ----------------------------

def edge_index_to_mask_bias(edge_index, num_nodes):
    # adj[dst, src] = 1 for every edge, plus self-loops (PyG add_self_loops=True),
    # converted to an additive softmax mask: 0 where edge exists, -1e30 elsewhere.
    adj = jnp.zeros((num_nodes, num_nodes), jnp.float32)
    adj = adj.at[edge_index[1], edge_index[0]].set(1.0)
    adj = jnp.minimum(adj + jnp.eye(num_nodes, dtype=jnp.float32), 1.0)
    return jnp.where(adj > 0.0, 0.0, -1e30).astype(jnp.float32)


def prepare_gat(params, edge_index, *, num_nodes, heads, hid, n_cls):
    """One-time precompute (hoisted out of the per-call hot path)."""
    in_ch = params["w1"].shape[0]

    # Fold attention vectors into the projection weights (exact algebraic fold):
    #   alpha_src[i, h] = sum_c (x W)[i, h*C+c] * a_src[h, c] = (x @ (W·a_src))[i, h]
    w1 = params["w1"]                                   # [in_ch, H*hid]
    w1r = w1.reshape(in_ch, heads, hid)
    w_as1 = jnp.einsum("fhc,hc->fh", w1r, params["as1"])
    w_ad1 = jnp.einsum("fhc,hc->fh", w1r, params["ad1"])
    w1e = jnp.concatenate([w1, w_as1, w_ad1], axis=1)   # [in_ch, H*hid + 2H]

    w2 = params["w2"]                                   # [H*hid, n_cls]
    w_as2 = w2 @ params["as2"].T                        # [H*hid, 1]
    w_ad2 = w2 @ params["ad2"].T                        # [H*hid, 1]
    w2e = jnp.concatenate([w2, w_as2, w_ad2], axis=1)   # [H*hid, n_cls + 2]

    # Graph-structure constants.
    # TODO(synk): store these as bf16 for large N (halves HBM/VMEM traffic).
    mask_bias = edge_index_to_mask_bias(edge_index, num_nodes)       # [N, N]
    mask_tiled = jnp.tile(mask_bias, (1, heads))                     # [N, H*N]

    col_head = jnp.arange(heads * num_nodes, dtype=jnp.int32) // num_nodes
    rep_mat = (col_head[None, :] ==
               jnp.arange(heads, dtype=jnp.int32)[:, None]).astype(jnp.float32)
    ones_bd = rep_mat.T                                              # [H*N, H]

    out_head = jnp.arange(heads * hid, dtype=jnp.int32) // hid
    blk_mask = (col_head[:, None] == out_head[None, :]).astype(jnp.float32)

    return dict(w1e=w1e, b1=params["b1"], w2e=w2e, b2=params["b2"],
                mask_bias=mask_bias, mask_tiled=mask_tiled,
                rep_mat=rep_mat, ones_bd=ones_bd, blk_mask=blk_mask)


# ------------------------------- per-call path -------------------------------

def gat_forward_pallas(x, prep, *, heads, hid, n_cls):
    """Full 2-layer GAT forward in one pallas_call; returns [N, n_cls] log-probs."""
    N = x.shape[0]
    OUT_PAD = 128

    kernel = functools.partial(_gat2_kernel, n=N, heads=heads, hid=hid,
                               n_cls=n_cls, out_pad=OUT_PAD)
    vmem = pl.BlockSpec(memory_space=pltpu.MemorySpace.VMEM)
    out = pl.pallas_call(
        kernel,
        out_shape=jax.ShapeDtypeStruct((N, OUT_PAD), jnp.float32),
        in_specs=[vmem] * 10,
        out_specs=vmem,
    )(x, prep["w1e"], prep["b1"], prep["w2e"], prep["b2"],
      prep["mask_bias"], prep["mask_tiled"], prep["rep_mat"],
      prep["ones_bd"], prep["blk_mask"])
    return out[:, :n_cls]


def init_params(key, in_channels, hidden_channels, out_channels, heads):
    ks = jax.random.split(key, 8)

    def glorot(k, shape):
        fan_in, fan_out = shape[0], shape[-1]
        limit = jnp.sqrt(6.0 / (fan_in + fan_out))
        return jax.random.uniform(k, shape, jnp.float32, -limit, limit)

    return {
        "w1": glorot(ks[0], (in_channels, heads * hidden_channels)),
        "as1": glorot(ks[1], (heads, hidden_channels)),
        "ad1": glorot(ks[2], (heads, hidden_channels)),
        "b1": jnp.zeros((1, heads * hidden_channels), jnp.float32),
        "w2": glorot(ks[3], (heads * hidden_channels, out_channels)),
        "as2": glorot(ks[4], (1, out_channels)),
        "ad2": glorot(ks[5], (1, out_channels)),
        "b2": jnp.zeros((1, out_channels), jnp.float32),
    }


if __name__ == "__main__":
    N = 16            # nodes
    IN_CH = 16        # in_channels
    HID = 8           # hidden_channels
    HEADS = 8
    N_CLS = 4         # out_channels

    key = jax.random.PRNGKey(0)
    k_x, k_p = jax.random.split(key)

    x = jax.random.normal(k_x, (N, IN_CH), jnp.float32)

    # simple ring graph, both directions -> edge_index of shape [2, 2N]
    src = jnp.arange(N, dtype=jnp.int32)
    dst = (src + 1) % N
    edge_index = jnp.stack([jnp.concatenate([src, dst]),
                            jnp.concatenate([dst, src])], axis=0)

    params = init_params(k_p, IN_CH, HID, N_CLS, HEADS)

    # One-time setup: weight folds + graph constants (NOT in the per-call path).
    prep = prepare_gat(params, edge_index,
                       num_nodes=N, heads=HEADS, hid=HID, n_cls=N_CLS)
    prep = jax.tree_util.tree_map(jax.block_until_ready, prep)

    @jax.jit
    def gat_forward(x, prep):
        # F.dropout: identity in eval mode.
        return gat_forward_pallas(x, prep, heads=HEADS, hid=HID, n_cls=N_CLS)

    out = gat_forward(x, prep)
    jax.block_until_ready(out)
    assert out.shape == (N, N_CLS)
    assert bool(jnp.all(jnp.isfinite(out)))
    print("KERNEL_OK")
</pallas_src>

<mosaic_0001>
module attributes {stable_mosaic.version = 11 : i64} {
  func.func @_gat2_kernel(%arg0: memref<16x16xf32, #tpu.memory_space<vmem>>, %arg1: memref<16x80xf32, #tpu.memory_space<vmem>>, %arg2: memref<1x64xf32, #tpu.memory_space<vmem>>, %arg3: memref<64x6xf32, #tpu.memory_space<vmem>>, %arg4: memref<1x4xf32, #tpu.memory_space<vmem>>, %arg5: memref<16x16xf32, #tpu.memory_space<vmem>>, %arg6: memref<16x128xf32, #tpu.memory_space<vmem>>, %arg7: memref<8x128xf32, #tpu.memory_space<vmem>>, %arg8: memref<128x8xf32, #tpu.memory_space<vmem>>, %arg9: memref<128x64xf32, #tpu.memory_space<vmem>>, %arg10: memref<16x128xf32, #tpu.memory_space<vmem>>) attributes {dimension_semantics = [], scalar_prefetch = 0 : i64, scratch_operands = 0 : i64, tpu.core_type = #tpu.core_type<tc>} {
    %c0 = arith.constant 0 : index
    %c0_0 = arith.constant 0 : index
    %0 = vector.load %arg0[%c0, %c0_0] : memref<16x16xf32, #tpu.memory_space<vmem>>, vector<16x16xf32>
    %c0_1 = arith.constant 0 : index
    %c0_2 = arith.constant 0 : index
    %1 = vector.load %arg1[%c0_1, %c0_2] : memref<16x80xf32, #tpu.memory_space<vmem>>, vector<16x80xf32>
    %cst = arith.constant dense<0.000000e+00> : vector<16x80xf32>
    %2 = tpu.matmul %0, %1, %cst {dimension_numbers = #tpu.dot_dimension_numbers<[1], [0], [0], [1], [0, 0, 1, 1], [], []>} : vector<16x16xf32>, vector<16x80xf32>, vector<16x80xf32> -> vector<16x80xf32>
    %3 = vector.extract_strided_slice %2 {offsets = [0, 0], sizes = [16, 64], strides = [1, 1]} : vector<16x80xf32> to vector<16x64xf32>
    %4 = vector.extract_strided_slice %2 {offsets = [0, 64], sizes = [16, 8], strides = [1, 1]} : vector<16x80xf32> to vector<16x8xf32>
    %5 = vector.extract_strided_slice %2 {offsets = [0, 72], sizes = [16, 8], strides = [1, 1]} : vector<16x80xf32> to vector<16x8xf32>
    %c0_3 = arith.constant 0 : index
    %c0_4 = arith.constant 0 : index
    %6 = vector.load %arg7[%c0_3, %c0_4] : memref<8x128xf32, #tpu.memory_space<vmem>>, vector<8x128xf32>
    %cst_5 = arith.constant dense<0.000000e+00> : vector<16x128xf32>
    %7 = tpu.matmul %5, %6, %cst_5 {dimension_numbers = #tpu.dot_dimension_numbers<[1], [0], [0], [1], [0, 0, 1, 1], [], []>} : vector<16x8xf32>, vector<8x128xf32>, vector<16x128xf32> -> vector<16x128xf32>
    %8 = tpu.transpose %4, [1, 0] : vector<16x8xf32> -> vector<8x16xf32>
    %9 = vector.extract_strided_slice %8 {offsets = [0, 0], sizes = [1, 16], strides = [1, 1]} : vector<8x16xf32> to vector<1x16xf32>
    %10 = vector.extract_strided_slice %8 {offsets = [1, 0], sizes = [1, 16], strides = [1, 1]} : vector<8x16xf32> to vector<1x16xf32>
    %11 = vector.extract_strided_slice %8 {offsets = [2, 0], sizes = [1, 16], strides = [1, 1]} : vector<8x16xf32> to vector<1x16xf32>
    %12 = vector.extract_strided_slice %8 {offsets = [3, 0], sizes = [1, 16], strides = [1, 1]} : vector<8x16xf32> to vector<1x16xf32>
    %13 = vector.extract_strided_slice %8 {offsets = [4, 0], sizes = [1, 16], strides = [1, 1]} : vector<8x16xf32> to vector<1x16xf32>
    %14 = vector.extract_strided_slice %8 {offsets = [5, 0], sizes = [1, 16], strides = [1, 1]} : vector<8x16xf32> to vector<1x16xf32>
    %15 = vector.extract_strided_slice %8 {offsets = [6, 0], sizes = [1, 16], strides = [1, 1]} : vector<8x16xf32> to vector<1x16xf32>
    %16 = vector.extract_strided_slice %8 {offsets = [7, 0], sizes = [1, 16], strides = [1, 1]} : vector<8x16xf32> to vector<1x16xf32>
    %17 = tpu.concatenate %9, %10, %11, %12, %13, %14, %15, %16 in 1 : vector<1x16xf32>, vector<1x16xf32>, vector<1x16xf32>, vector<1x16xf32>, vector<1x16xf32>, vector<1x16xf32>, vector<1x16xf32>, vector<1x16xf32> -> vector<1x128xf32>
    %18 = vector.broadcast %17 : vector<1x128xf32> to vector<16x128xf32>
    %19 = arith.addf %7, %18 : vector<16x128xf32>
    %cst_6 = arith.constant 0.000000e+00 : f32
    %20 = vector.broadcast %cst_6 : f32 to vector<16x128xf32>
    %21 = arith.cmpf ogt, %19, %20 : vector<16x128xf32>
    %cst_7 = arith.constant 2.000000e-01 : f32
    %22 = vector.broadcast %cst_7 : f32 to vector<16x128xf32>
    %23 = arith.mulf %22, %19 : vector<16x128xf32>
    %24 = arith.select %21, %19, %23 : vector<16x128xi1>, vector<16x128xf32>
    %c0_8 = arith.constant 0 : index
    %c0_9 = arith.constant 0 : index
    %25 = vector.load %arg6[%c0_8, %c0_9] : memref<16x128xf32, #tpu.memory_space<vmem>>, vector<16x128xf32>
    %26 = arith.addf %24, %25 : vector<16x128xf32>
    %cst_10 = arith.constant dense<0xFF800000> : vector<8xf32>
    %27 = vector.multi_reduction <maximumf>, %4, %cst_10 [0] : vector<16x8xf32> to vector<8xf32>
    %28 = vector.shape_cast %27 : vector<8xf32> to vector<1x8xf32>
    %29 = vector.broadcast %28 : vector<1x8xf32> to vector<16x8xf32>
    %30 = arith.addf %5, %29 : vector<16x8xf32>
    %cst_11 = arith.constant 0.000000e+00 : f32
    %31 = vector.broadcast %cst_11 : f32 to vector<16x8xf32>
    %32 = arith.cmpf ogt, %30, %31 : vector<16x8xf32>
    %cst_12 = arith.constant 2.000000e-01 : f32
    %33 = vector.broadcast %cst_12 : f32 to vector<16x8xf32>
    %34 = arith.mulf %33, %30 : vector<16x8xf32>
    %35 = arith.select %32, %30, %34 : vector<16x8xi1>, vector<16x8xf32>
    %cst_13 = arith.constant dense<0.000000e+00> : vector<16x128xf32>
    %36 = tpu.matmul %35, %6, %cst_13 {dimension_numbers = #tpu.dot_dimension_numbers<[1], [0], [0], [1], [0, 0, 1, 1], [], []>} : vector<16x8xf32>, vector<8x128xf32>, vector<16x128xf32> -> vector<16x128xf32>
    %37 = arith.subf %26, %36 : vector<16x128xf32>
    %38 = math.exp %37 : vector<16x128xf32>
    %c0_14 = arith.constant 0 : index
    %c0_15 = arith.constant 0 : index
    %39 = vector.load %arg8[%c0_14, %c0_15] : memref<128x8xf32, #tpu.memory_space<vmem>>, vector<128x8xf32>
    %cst_16 = arith.constant dense<0.000000e+00> : vector<16x8xf32>
    %40 = tpu.matmul %38, %39, %cst_16 {dimension_numbers = #tpu.dot_dimension_numbers<[1], [0], [0], [1], [0, 0, 1, 1], [], []>} : vector<16x128xf32>, vector<128x8xf32>, vector<16x8xf32> -> vector<16x8xf32>
    %cst_17 = arith.constant 1.000000e-30 : f32
    %41 = vector.broadcast %cst_17 : f32 to vector<16x8xf32>
    %42 = arith.maximumf %40, %41 : vector<16x8xf32>
    %43 = tpu.reciprocal %42 : vector<16x8xf32> -> vector<16x8xf32>
    %cst_18 = arith.constant dense<0.000000e+00> : vector<16x128xf32>
    %44 = tpu.matmul %43, %6, %cst_18 {dimension_numbers = #tpu.dot_dimension_numbers<[1], [0], [0], [1], [0, 0, 1, 1], [], []>} : vector<16x8xf32>, vector<8x128xf32>, vector<16x128xf32> -> vector<16x128xf32>
    %45 = arith.mulf %38, %44 : vector<16x128xf32>
    %46 = tpu.concatenate %3, %3, %3, %3, %3, %3, %3, %3 in 0 : vector<16x64xf32>, vector<16x64xf32>, vector<16x64xf32>, vector<16x64xf32>, vector<16x64xf32>, vector<16x64xf32>, vector<16x64xf32>, vector<16x64xf32> -> vector<128x64xf32>
    %c0_19 = arith.constant 0 : index
    %c0_20 = arith.constant 0 : index
    %47 = vector.load %arg9[%c0_19, %c0_20] : memref<128x64xf32, #tpu.memory_space<vmem>>, vector<128x64xf32>
    %48 = arith.mulf %46, %47 : vector<128x64xf32>
    %cst_21 = arith.constant dense<0.000000e+00> : vector<16x64xf32>
    %49 = tpu.matmul %45, %48, %cst_21 {dimension_numbers = #tpu.dot_dimension_numbers<[1], [0], [0], [1], [0, 0, 1, 1], [], []>} : vector<16x128xf32>, vector<128x64xf32>, vector<16x64xf32> -> vector<16x64xf32>
    %c0_22 = arith.constant 0 : index
    %c0_23 = arith.constant 0 : index
    %50 = vector.load %arg2[%c0_22, %c0_23] : memref<1x64xf32, #tpu.memory_space<vmem>>, vector<1x64xf32>
    %51 = vector.broadcast %50 : vector<1x64xf32> to vector<16x64xf32>
    %52 = arith.addf %49, %51 : vector<16x64xf32>
    %cst_24 = arith.constant 0.000000e+00 : f32
    %53 = vector.broadcast %cst_24 : f32 to vector<16x64xf32>
    %54 = arith.maximumf %52, %53 : vector<16x64xf32>
    %c0_25 = arith.constant 0 : index
    %c0_26 = arith.constant 0 : index
    %55 = vector.load %arg3[%c0_25, %c0_26] : memref<64x6xf32, #tpu.memory_space<vmem>>, vector<64x6xf32>
    %cst_27 = arith.constant dense<0.000000e+00> : vector<16x6xf32>
    %56 = tpu.matmul %54, %55, %cst_27 {dimension_numbers = #tpu.dot_dimension_numbers<[1], [0], [0], [1], [0, 0, 1, 1], [], []>} : vector<16x64xf32>, vector<64x6xf32>, vector<16x6xf32> -> vector<16x6xf32>
    %57 = vector.extract_strided_slice %56 {offsets = [0, 0], sizes = [16, 4], strides = [1, 1]} : vector<16x6xf32> to vector<16x4xf32>
    %58 = vector.extract_strided_slice %56 {offsets = [0, 4], sizes = [16, 1], strides = [1, 1]} : vector<16x6xf32> to vector<16x1xf32>
    %59 = vector.extract_strided_slice %56 {offsets = [0, 5], sizes = [16, 1], strides = [1, 1]} : vector<16x6xf32> to vector<16x1xf32>
    %60 = tpu.transpose %58, [1, 0] : vector<16x1xf32> -> vector<1x16xf32>
    %61 = vector.broadcast %59 : vector<16x1xf32> to vector<16x16xf32>
    %62 = vector.broadcast %60 : vector<1x16xf32> to vector<16x16xf32>
    %63 = arith.addf %61, %62 : vector<16x16xf32>
    %cst_28 = arith.constant 0.000000e+00 : f32
    %64 = vector.broadcast %cst_28 : f32 to vector<16x16xf32>
    %65 = arith.cmpf ogt, %63, %64 : vector<16x16xf32>
    %cst_29 = arith.constant 2.000000e-01 : f32
    %66 = vector.broadcast %cst_29 : f32 to vector<16x16xf32>
    %67 = arith.mulf %66, %63 : vector<16x16xf32>
    %68 = arith.select %65, %63, %67 : vector<16x16xi1>, vector<16x16xf32>
    %c0_30 = arith.constant 0 : index
    %c0_31 = arith.constant 0 : index
    %69 = vector.load %arg5[%c0_30, %c0_31] : memref<16x16xf32, #tpu.memory_space<vmem>>, vector<16x16xf32>
    %70 = arith.addf %68, %69 : vector<16x16xf32>
    %cst_32 = arith.constant dense<0xFF800000> : vector<16xf32>
    %71 = vector.multi_reduction <maximumf>, %70, %cst_32 [1] : vector<16x16xf32> to vector<16xf32>
    %72 = vector.shape_cast %71 : vector<16xf32> to vector<16x1xf32>
    %73 = vector.broadcast %72 : vector<16x1xf32> to vector<16x16xf32>
    %74 = arith.subf %70, %73 : vector<16x16xf32>
    %75 = math.exp %74 : vector<16x16xf32>
    %cst_33 = arith.constant dense<0.000000e+00> : vector<16xf32>
    %76 = vector.multi_reduction <add>, %75, %cst_33 [1] : vector<16x16xf32> to vector<16xf32>
    %77 = vector.shape_cast %76 : vector<16xf32> to vector<16x1xf32>
    %cst_34 = arith.constant 1.000000e-30 : f32
    %78 = vector.broadcast %cst_34 : f32 to vector<16x1xf32>
    %79 = arith.maximumf %77, %78 : vector<16x1xf32>
    %80 = tpu.reciprocal %79 : vector<16x1xf32> -> vector<16x1xf32>
    %81 = vector.broadcast %80 : vector<16x1xf32> to vector<16x16xf32>
    %82 = arith.mulf %75, %81 : vector<16x16xf32>
    %cst_35 = arith.constant dense<0.000000e+00> : vector<16x4xf32>
    %83 = tpu.matmul %82, %57, %cst_35 {dimension_numbers = #tpu.dot_dimension_numbers<[1], [0], [0], [1], [0, 0, 1, 1], [], []>} : vector<16x16xf32>, vector<16x4xf32>, vector<16x4xf32> -> vector<16x4xf32>
    %c0_36 = arith.constant 0 : index
    %c0_37 = arith.constant 0 : index
    %84 = vector.load %arg4[%c0_36, %c0_37] : memref<1x4xf32, #tpu.memory_space<vmem>>, vector<1x4xf32>
    %85 = vector.broadcast %84 : vector<1x4xf32> to vector<16x4xf32>
    %86 = arith.addf %83, %85 : vector<16x4xf32>
    %cst_38 = arith.constant dense<0xFF800000> : vector<16xf32>
    %87 = vector.multi_reduction <maximumf>, %86, %cst_38 [1] : vector<16x4xf32> to vector<16xf32>
    %88 = vector.shape_cast %87 : vector<16xf32> to vector<16x1xf32>
    %89 = vector.broadcast %88 : vector<16x1xf32> to vector<16x4xf32>
    %90 = arith.subf %86, %89 : vector<16x4xf32>
    %91 = math.exp %90 : vector<16x4xf32>
    %cst_39 = arith.constant dense<0.000000e+00> : vector<16xf32>
    %92 = vector.multi_reduction <add>, %91, %cst_39 [1] : vector<16x4xf32> to vector<16xf32>
    %93 = vector.shape_cast %92 : vector<16xf32> to vector<16x1xf32>
    %94 = math.log %93 : vector<16x1xf32>
    %95 = vector.broadcast %94 : vector<16x1xf32> to vector<16x4xf32>
    %96 = arith.subf %90, %95 : vector<16x4xf32>
    %cst_40 = arith.constant 0.000000e+00 : f32
    %97 = vector.broadcast %cst_40 : f32 to vector<16x124xf32>
    %98 = tpu.concatenate %96, %97 in 1 : vector<16x4xf32>, vector<16x124xf32> -> vector<16x128xf32>
    %c0_41 = arith.constant 0 : index
    %c0_42 = arith.constant 0 : index
    %99 = vector.load %arg10[%c0_41, %c0_42] : memref<16x128xf32, #tpu.memory_space<vmem>>, vector<16x128xf32>
    tpu.vector_store %arg10[%c0_41, %c0_42], %98 {strides = array<i32>} : memref<16x128xf32, #tpu.memory_space<vmem>>, vector<16x128xf32>,
    return
  }
}

</mosaic_0001>

<bundles_post_ra>
// kernel: gat_forward.1
= control target key start
LH: loop header
LB: loop body
LE: loop exit
PB: predicated region body
PF: predicated region fallthrough
CT: control target
= control target key end

     0   :  { %vm39_vm0 = vcmask 130048   ;;  %vm302_vm1 = vcmask 589312   ;;  %s1328_s17 = smov 56   ;;  %vm212_vm2 = vcmask 64512   ;;  %s1331_s12 = smov 16   ;;  %vm192_vm5 = vcmask 261120   ;;  %s1669_s1 = inlined_call_operand.vmem [shape: f32[16,80], index: 1, kind: input, shape index: {}]   ;;  %s1670_s0 = inlined_call_operand.vmem [shape: f32[16,16], index: 0, kind: input, shape index: {}]   ;;  %s1671_s9 = inlined_call_operand.vmem [shape: f32[128,64], index: 9, kind: input, shape index: {}]   ;;  %s1672_s7 = inlined_call_operand.vmem [shape: f32[8,128], index: 7, kind: input, shape index: {}]   ;;  %s1673_s8 = inlined_call_operand.vmem [shape: f32[128,8], index: 8, kind: input, shape index: {}]   ;;  %s1674_s6 = inlined_call_operand.vmem [shape: f32[16,128], index: 6, kind: input, shape index: {}]   ;;  %s1675_s3 = inlined_call_operand.vmem [shape: f32[64,6], index: 3, kind: input, shape index: {}]   ;;  %s1676_s2 = inlined_call_operand.vmem [shape: f32[1,64], index: 2, kind: input, shape index: {}]   ;;  %s1677_s5 = inlined_call_operand.vmem [shape: f32[16,16], index: 5, kind: input, shape index: {}]   ;;  %s1678_s4 = inlined_call_operand.vmem [shape: f32[1,4], index: 4, kind: input, shape index: {}]   ;;  %s1679_s10 = inlined_call_operand.vmem [shape: f32[16,128], index: 10, kind: output, shape index: {}]  }
   0x1   :  { %v37_v0 = vld [vmem:[%s1669_s1] sm:$0xff]  ;;  %v38_v1 = vld [vmem:[%s1669_s1 + $0x8] sm:$0xff]  ;;  %v596_v6 = vld [vmem:[%s1671_s9 + $0x18] sm:$0xff]  ;;  %s1333_s22 = smov 48   ;;  %s1334_s29 = smov 80   ;;  %vm194_vm6 = vcmask 392192  }
   0x2   :  { %v35_v2 = vld [vmem:[%s1670_s0] sm:$0xff]  ;;  %v1202_v3 = vpack.c.bf16 %v38_v1, %v37_v0  ;;  %v36_v4 = vld [vmem:[%s1670_s0 + $0x8] sm:$0xff]  ;;  %v595_v9 = vld [vmem:[%s1671_s9 + $0x10] sm:$0xff]  ;;  %vm196_vm7 = vcmask 523264   ;;  %vm198_vm8 = vcmask 654336   ;;  %vm200_vm9 = vcmask 785408  }
   0x3   :  { %1088 = vmatprep.mubr.msk.f32.mxu0 %vm39_vm0, %v35_v2  ;;  %v594_v5 = vld [vmem:[%s1671_s9 + $0x8] sm:$0xff]  ;;  %v593_v8 = vld [vmem:[%s1671_s9] sm:$0xff]  ;;  %v599_v12 = vld [vmem:[%s1671_s9 + $0x30] sm:$0xff]  ;;  %vm202_vm10 = vcmask 916480   ;;  %vm974_vm15 = vcmask 31744  }
   0x4   :  { %1203 = vmatprep.subr.bf16.mxu0 %v1202_v3  ;;  %v598_v7 = vld [vmem:[%s1671_s9 + $0x28] sm:$0xff]  ;;  %v597_v10 = vld [vmem:[%s1671_s9 + $0x20] sm:$0xff]  ;;  %v600_v13 = vld [vmem:[%s1671_s9 + $0x38] sm:$0xff] }
   0x5   :  { %1205 = vmatpush3.bf16.msra.mxu0 %v1202_v3  ;;  %v601_v14 = vld [vmem:[%s1671_s9 + $0x40] sm:$0xff]  ;;  %v602_v20 = vld [vmem:[%s1671_s9 + $0x48] sm:$0xff]  ;;  %v603_v25 = vld [vmem:[%s1671_s9 + $0x50] sm:$0xff] }
   0x6   :  { %v604_v26 = vld [vmem:[%s1671_s9 + $0x58] sm:$0xff]  ;;  %v605_v31 = vld [vmem:[%s1671_s9 + $0x60] sm:$0xff]  ;;  %v606_v32 = vld [vmem:[%s1671_s9 + $0x68] sm:$0xff] }
   0x7   :  { %v607_v33 = vld [vmem:[%s1671_s9 + $0x70] sm:$0xff]  ;;  %v608_v38 = vld [vmem:[%s1671_s9 + $0x78] sm:$0xff]  ;;  %v121_v40 = vld [vmem:[%s1672_s7] sm:$0xff]  ;;  %s1329_s7 = smov 8   ;;  %s1330_s9 = smov 64  }
   0x8   :  { %1089 = vmatmul.mubr.msk.f32.vlgmr.msra.gmra.mrb[0].mxu0 %vm39_vm0, %v36_v4  ;;  %1091 = vmatprep.subr.mxu1 %v121_v40 }
   0x9   :  { %1092 = vmatpush3.msra.mxu1 %v121_v40 }
   0xa   :  { %1096 = vmatprep.subr.mxu1 %v121_v40 }
  0xdb   :  { %v1426_v11 = vpop.f32.mrb[0].mxu0 }
  0xdc   :  { %210 = vrot.lane.b32.xlu1 %v1426_v11, %s1328_s17  ;;  %v1439_v15 = vpop.f32.mrb[1].mxu0  ;;  %v304_v16 = vsel %vm302_vm1, %v1426_v11, -inf  ;;  %v610_v17 = vmul.f32 %v1426_v11, %v594_v5  ;;  %v612_v18 = vmul.f32 %v1426_v11, %v596_v6  ;;  %v614_v19 = vmul.f32 %v1426_v11, %v598_v7 }
  0xdd   :  { %v303_v21 = vsel %vm302_vm1, %v1439_v15, -inf  ;;  %v609_v22 = vmul.f32 %v593_v8, %v1439_v15  ;;  %v611_v23 = vmul.f32 %v595_v9, %v1439_v15  ;;  %v613_v24 = vmul.f32 %v597_v10, %v1439_v15 }
  0xde   :  { %v305_v27 = vmax.f32 %v303_v21, %v304_v16  ;;  %v615_v28 = vmul.f32 %v599_v12, %v1439_v15  ;;  %v616_v29 = vmul.f32 %v1426_v11, %v600_v13  ;;  %v617_v30 = vmul.f32 %v601_v14, %v1439_v15  ;;  %v416_v12 = vld [vmem:[%s1673_s8 + $0x8] sm:$0xff]  ;;  %v418_v16 = vld [vmem:[%s1673_s8 + $0x18] sm:$0xff] }
  0xdf   :  { %v1472_v34 = vpack.c.bf16 %v610_v17, %v609_v22  ;;  %v1474_v35 = vpack.c.bf16 %v612_v18, %v611_v23  ;;  %v1476_v36 = vpack.c.bf16 %v614_v19, %v613_v24  ;;  %v618_v37 = vmul.f32 %v1426_v11, %v602_v20  ;;  %v419_v19 = vld [vmem:[%s1673_s8 + $0x20] sm:$0xff]  ;;  %v420_v20 = vld [vmem:[%s1673_s8 + $0x28] sm:$0xff]  ;;  %v421_v23 = vld [vmem:[%s1673_s8 + $0x30] sm:$0xff] }
  0xe0   :  { %v306_v39 = vrot.slane %v305_v27, 4  ;;  %v1485_v41 = vpack.c.bf16 %v616_v29, %v615_v28  ;;  %v619_v42 = vmul.f32 %v603_v25, %v1439_v15  ;;  %v620_v43 = vmul.f32 %v1426_v11, %v604_v26  ;;  %v422_v24 = vld [vmem:[%s1673_s8 + $0x38] sm:$0xff]  ;;  %v424_v28 = vld [vmem:[%s1673_s8 + $0x48] sm:$0xff] }
  0xe1   :  { %v1489_v44 = vpack.c.bf16 %v618_v37, %v617_v30  ;;  %v621_v45 = vmul.f32 %v605_v31, %v1439_v15  ;;  %v622_v46 = vmul.f32 %v1426_v11, %v606_v32  ;;  %v623_v47 = vmul.f32 %v607_v33, %v1439_v15  ;;  %v425_v31 = vld [vmem:[%s1673_s8 + $0x50] sm:$0xff]  ;;  %v426_v32 = vld [vmem:[%s1673_s8 + $0x58] sm:$0xff]  ;;  %v427_v37 = vld [vmem:[%s1673_s8 + $0x60] sm:$0xff] }
  0xe2   :  { %v307_v48 = vmax.f32 %v305_v27, %v306_v39  ;;  %v1494_v49 = vpack.c.bf16 %v620_v43, %v619_v42  ;;  %v624_v50 = vmul.f32 %v1426_v11, %v608_v38  ;;  %v1214_v21 = vpack.c.bf16 %v420_v20, %v419_v19  ;;  %v423_v27 = vld [vmem:[%s1673_s8 + $0x40] sm:$0xff]  ;;  %v428_v38 = vld [vmem:[%s1673_s8 + $0x68] sm:$0xff]  ;;  %v429_v39 = vld [vmem:[%s1673_s8 + $0x70] sm:$0xff] }
  0xe3   :  { %v1497_v51 = vpack.c.bf16 %v622_v46, %v621_v45  ;;  %v1218_v25 = vpack.c.bf16 %v422_v24, %v421_v23  ;;  %v1222_v29 = vpack.c.bf16 %v424_v28, %v423_v27  ;;  %v1226_v33 = vpack.c.bf16 %v426_v32, %v425_v31  ;;  %v430_v42 = vld [vmem:[%s1673_s8 + $0x78] sm:$0xff]  ;;  %v715_v31 = vld [vmem:[%s1675_s3 + $0x30] sm:$0xff] }
  0xe4   :  { %v308_v52 = vrot.slane %v307_v48, 2  ;;  %v1499_v53 = vpack.c.bf16 %v624_v50, %v623_v47  ;;  %v1234_v43 = vpack.c.bf16 %v430_v42, %v429_v39  ;;  %v716_v32 = vld [vmem:[%s1675_s3 + $0x38] sm:$0xff] }
  0xe6   :  { %v309_v54 = vmax.f32 %v307_v48, %v308_v52 }
  0xe8   :  { %v310_v55 = vrot.slane %v309_v54, 1 }
  0xea   :  { %v311_v56 = vmax.f32 %v309_v54, %v310_v55  ;;  %v204_v54 = vlaneseq }
  0xec   :  { %313 = vrot.lane.b32.xlu0 %v311_v56, %s1329_s7  ;;  %v1578_v56 = vshrl.u32 %v204_v54, 7 }
  0xf0   :  { %208 = vrot.lane.b32.xlu0 %v1439_v15, %s1328_s17 }
 0x14e   :  { %v211_v1 = vpop.permute.xlu1 %210 }
 0x15e   :  { %v314_v57 = vpop.permute.xlu0 %313 }
 0x15f   :  { %v316_v58 = vadd.f32 %v314_v57, %v1439_v15  ;;  %v317_v59 = vadd.f32 %v1426_v11, %v314_v57 }
 0x161   :  { %vm319_vm3 = vcmp.gt.f32.partialorder %v317_v59, 0.0  ;;  %v321_v60 = vmul.f32 0.2, %v317_v59  ;;  %vm318_vm4 = vcmp.gt.f32.partialorder %v316_v58, 0.0  ;;  %v320_v61 = vmul.f32 0.2, %v316_v58 }
 0x162   :  { %v209_v62 = vpop.permute.xlu0 %208 }
 0x163   :  { %1093 = vmatprep.mubr.msk.f32.mxu1 %vm212_vm2, %v209_v62  ;;  %v323_v63 = vsel %vm319_vm3, %v317_v59, %v321_v60  ;;  %v322_v0 = vsel %vm318_vm4, %v316_v58, %v320_v61  ;;  %v206_v62 = vsub.s32 0, %v1578_v56 }
 0x164   :  { %328 = vrot.lane.b32.xlu0 %v323_v63, %s1328_s17  ;;  %326 = vrot.lane.b32.xlu1 %v322_v0, %s1328_s17  ;;  %s1332_s17 = smov 32  }
 0x165   :  { %1094 = vmatmul.mubr.msk.f32.vlgmr.msra.gmra.mrb[0].mxu1 %vm212_vm2, %v211_v1 }
 0x166   :  { %1097 = vmatpush3.msra.mxu1 %v121_v40 }
 0x167   :  { %1136 = vmatprep.subr.mxu1 %v121_v40 }
 0x168   :  { %126 = vrot.lane.b32.xlu0 %v1426_v11, %s1330_s9  ;;  %124 = vrot.lane.b32.xlu1 %v1439_v15, %s1330_s9  ;;  %v415_v11 = vld [vmem:[%s1673_s8] sm:$0xff]  ;;  %v417_v15 = vld [vmem:[%s1673_s8 + $0x10] sm:$0xff] }
 0x169   :  { %v1206_v13 = vpack.c.bf16 %v416_v12, %v415_v11  ;;  %v1210_v17 = vpack.c.bf16 %v418_v16, %v417_v15 }
 0x16b   :  { %1207 = vmatprep.subr.bf16.mxu0 %v1206_v13 }
 0x16c   :  { %1209 = vmatpush3.bf16.msra.mxu0 %v1206_v13 }
 0x16d   :  { %1211 = vmatprep.subr.bf16.mxu0 %v1210_v17 }
 0x170   :  { %1213 = vmatpush3.bf16.msra.mxu0 %v1210_v17 }
 0x171   :  { %1215 = vmatprep.subr.bf16.mxu0 %v1214_v21 }
 0x174   :  { %1217 = vmatpush3.bf16.msra.mxu0 %v1214_v21 }
 0x175   :  { %1219 = vmatprep.subr.bf16.mxu0 %v1218_v25 }
 0x178   :  { %1221 = vmatpush3.bf16.msra.mxu0 %v1218_v25 }
 0x179   :  { %1223 = vmatprep.subr.bf16.mxu0 %v1222_v29 }
 0x17c   :  { %1225 = vmatpush3.bf16.msra.mxu0 %v1222_v29 }
 0x17d   :  { %1227 = vmatprep.subr.bf16.mxu0 %v1226_v33 }
 0x180   :  { %1229 = vmatpush3.bf16.msra.mxu0 %v1226_v33  ;;  %v1282_v33 = vpack.c.bf16 %v716_v32, %v715_v31 }
 0x1d6   :  { %v327_v2 = vpop.permute.xlu1 %326  ;;  %v329_v3 = vpop.permute.xlu0 %328 }
 0x1d7   :  { %1098 = vmatprep.mubr.msk.f32.mxu1 %vm212_vm2, %v327_v2 }
 0x1d8   :  { %1099 = vmatmul.mubr.msk.f32.vlgmr.msra.gmra.mrb[2].mxu1 %vm212_vm2, %v329_v3 }
 0x1d9   :  { %1137 = vmatpush3.msra.mxu1 %v121_v40  ;;  %v1230_v40 = vpack.c.bf16 %v428_v38, %v427_v37  ;;  %v1337_v37 = vmov 5   ;;  %v1015_v38 = vld [vmem:[%s1676_s2] ss:$0 sm:$0xff] }
 0x1da   :  { %1239 = vmatprep.subr.bf16.mxu1 %v1472_v34  ;;  %v125_v4 = vpop.permute.xlu1 %124  ;;  %v127_v5 = vpop.permute.xlu0 %126  ;;  %1303 = vset.pattern.permute.xlu0 %v1337_v37 }
 0x1db   :  { %130 = vxpose.xlu1.b32.start [1/2] (short) (narrow) %v125_v4, 8  ;;  %1231 = vmatprep.subr.bf16.mxu0 %v1230_v40 }
 0x1dc   :  { %1233 = vmatpush3.bf16.msra.mxu0 %v1230_v40 }
 0x1dd   :  { %1235 = vmatprep.subr.bf16.mxu0 %v1234_v43 }
 0x1df   :  { %131 = vxpose.xlu1.b32.end [2/2] (short) (narrow) %v127_v5, 8 }
 0x1e0   :  { %1237 = vmatpush3.bf16.msra.mxu0 %v1234_v43 }
 0x1fd   :  { %1302 = vset.pattern.permute.xlu1 %v1337_v37 }
 0x238   :  { %v1516_v6 = vpop.f32.mrb[0].mxu1 }
 0x239   :  { %v1518_v7 = vpop.f32.mrb[1].mxu1 }
 0x25b   :  { %v1520_v8 = vpop.trf.xlu1 }
 0x25c   :  { %v163_v9 = vrot.slane %v1520_v8, 1  ;;  %v167_v10 = vrot.slane %v1520_v8, 2  ;;  %v171_v14 = vrot.slane %v1520_v8, 3  ;;  %v175_v18 = vrot.slane %v1520_v8, 4 }
 0x25d   :  { %v179_v22 = vrot.slane %v1520_v8, 5  ;;  %v183_v26 = vrot.slane %v1520_v8, 6  ;;  %v187_v30 = vrot.slane %v1520_v8, 7 }
 0x25e   :  { %164 = vrot.lane.b32.xlu0 %v163_v9, %s1331_s12  ;;  %s1335_s12 = smov 96   ;;  %v299_v9 = vld [vmem:[%s1674_s6 + $0x8] sm:$0xff] }
 0x262   :  { %168 = vrot.lane.b32.xlu0 %v167_v10, %s1332_s17  ;;  %s1336_s17 = smov 112  }
 0x266   :  { %172 = vrot.lane.b32.xlu0 %v171_v14, %s1333_s22 }
 0x26a   :  { %176 = vrot.lane.b32.xlu0 %v175_v18, %s1330_s9 }
 0x26e   :  { %180 = vrot.lane.b32.xlu0 %v179_v22, %s1334_s29 }
 0x272   :  { %184 = vrot.lane.b32.xlu0 %v183_v26, %s1335_s12 }
 0x276   :  { %188 = vrot.lane.b32.xlu0 %v187_v30, %s1336_s17 }
 0x2ab   :  { %v1100_v45 = vpop.f32.mrb[2].mxu1 }
 0x2ac   :  { %v400_v46 = vpop.f32.mrb[3].mxu1 }
 0x2d0   :  { %v165_v47 = vpop.permute.xlu0 %164 }
 0x2d1   :  { %v191_v57 = vsel %vm39_vm0, %v1520_v8, %v165_v47  ;;  %v298_v8 = vld [vmem:[%s1674_s6] sm:$0xff] }
 0x2d4   :  { %v169_v48 = vpop.permute.xlu0 %168 }
 0x2d5   :  { %v193_v58 = vsel %vm192_vm5, %v191_v57, %v169_v48 }
 0x2d8   :  { %v173_v50 = vpop.permute.xlu0 %172 }
 0x2d9   :  { %v195_v60 = vsel %vm194_vm6, %v193_v58, %v173_v50 }
 0x2dc   :  { %v177_v52 = vpop.permute.xlu0 %176 }
 0x2dd   :  { %v197_v61 = vsel %vm196_vm7, %v195_v60, %v177_v52 }
 0x2e0   :  { %v181_v55 = vpop.permute.xlu0 %180 }
 0x2e1   :  { %v199_v63 = vsel %vm198_vm8, %v197_v61, %v181_v55 }
 0x2e4   :  { %v185_v59 = vpop.permute.xlu0 %184 }
 0x2e5   :  { %v201_v0 = vsel %vm200_vm9, %v199_v63, %v185_v59  ;;  %v859_v63 = vld [vmem:[%s1677_s5 + $0x8] sm:$0xff] }
 0x2e8   :  { %v189_v1 = vpop.permute.xlu0 %188 }
 0x2e9   :  { %v203_v2 = vsel %vm202_vm10, %v201_v0, %v189_v1  ;;  %v858_v0 = vld [vmem:[%s1677_s5] sm:$0xff] }
 0x2ea   :  { %v207_v3 = vrot.slane %v203_v2, %v206_v62 }
 0x2ec   :  { %v284_v4 = vadd.f32 %v1518_v7, %v207_v3  ;;  %v289_v5 = vadd.f32 %v1516_v6, %v207_v3 }
 0x2ee   :  { %vm292_vm11 = vcmp.gt.f32.partialorder %v284_v4, 0.0  ;;  %vm293_vm12 = vcmp.gt.f32.partialorder %v289_v5, 0.0  ;;  %v294_v10 = vmul.f32 0.2, %v284_v4  ;;  %v295_v11 = vmul.f32 0.2, %v289_v5 }
 0x2f0   :  { %v296_v12 = vsel %vm292_vm11, %v284_v4, %v294_v10  ;;  %v297_v13 = vsel %vm293_vm12, %v289_v5, %v295_v11 }
 0x2f1   :  { %v300_v14 = vadd.f32 %v298_v8, %v296_v12  ;;  %v301_v15 = vadd.f32 %v299_v9, %v297_v13 }
 0x2f3   :  { %v409_v16 = vsub.f32 %v300_v14, %v400_v46  ;;  %v410_v7 = vsub.f32 %v301_v15, %v1100_v45 }
 0x2f5   :  { %v411_v17 = vmul.f32 1.442695, %v409_v16  ;;  %v413_v6 = vmul.f32 1.442695, %v410_v7 }
 0x2f7   :  { %1304 = vpow2.f32 %v411_v17 }
 0x2f8   :  { %1306 = vpow2.f32 %v413_v6 }
 0x301   :  { %v1305_v18 = vpop.eup %1304 }
 0x302   :  { %v1307_v19 = vpop.eup %1306  ;;  %1133 = vmatprep.mubr.f32.mxu0 %v1305_v18 }
 0x303   :  { %1134 = vmatmul.mubr.f32.vlgmr.msra.gmra.mrb[2].mxu0 %v1307_v19 }
 0x3d6   :  { %v1135_v20 = vpop.f32.mrb[2].mxu0 }
 0x3d7   :  { %v507_v21 = vmax.f32 %v1135_v20, 1e-30  ;;  %v497_v22 = vpop.f32.mrb[3].mxu0 }
 0x3d8   :  { %v506_v23 = vmax.f32 %v497_v22, 1e-30 }
 0x3da   :  { %1308 = vrcp.f32 %v506_v23 }
 0x3db   :  { %1310 = vrcp.f32 %v507_v21 }
 0x3e4   :  { %v1309_v24 = vpop.eup %1308 }
 0x3e5   :  { %v1311_v25 = vpop.eup %1310  ;;  %1138 = vmatprep.mubr.msk.f32.mxu1 %vm212_vm2, %v1309_v24 }
 0x3e6   :  { %1139 = vmatmul.mubr.msk.f32.vlgmr.msra.gmra.mrb[4].mxu1 %vm212_vm2, %v1311_v25  ;;  %v1018_v25 = vld [vmem:[%s1678_s4] ss:$0 sm:$0xff] }
 0x3e7   :  { %1241 = vmatpush3.bf16.msra.mxu1 %v1472_v34  ;;  %v709_v34 = vld [vmem:[%s1675_s3] sm:$0xff] }
 0x3e8   :  { %1243 = vmatprep.subr.bf16.mxu1 %v1474_v35 }
 0x3eb   :  { %1245 = vmatpush3.bf16.msra.mxu1 %v1474_v35  ;;  %v710_v35 = vld [vmem:[%s1675_s3 + $0x8] sm:$0xff] }
 0x3ec   :  { %1247 = vmatprep.subr.bf16.mxu1 %v1476_v36 }
 0x3ef   :  { %1249 = vmatpush3.bf16.msra.mxu1 %v1476_v36  ;;  %v711_v36 = vld [vmem:[%s1675_s3 + $0x10] sm:$0xff] }
 0x3f0   :  { %1251 = vmatprep.subr.bf16.mxu1 %v1485_v41 }
 0x3f3   :  { %1253 = vmatpush3.bf16.msra.mxu1 %v1485_v41  ;;  %v1270_v41 = vpack.c.bf16 %v710_v35, %v709_v34 }
 0x3f4   :  { %1255 = vmatprep.subr.bf16.mxu1 %v1489_v44 }
 0x3f5   :  { %1271 = vmatprep.subr.bf16.mxu0 %v1270_v41 }
 0x3f6   :  { %1273 = vmatpush3.bf16.msra.mxu0 %v1270_v41 }
 0x3f7   :  { %1257 = vmatpush3.bf16.msra.mxu1 %v1489_v44  ;;  %v712_v44 = vld [vmem:[%s1675_s3 + $0x18] sm:$0xff] }
 0x3f8   :  { %1259 = vmatprep.subr.bf16.mxu1 %v1494_v49 }
 0x3fb   :  { %1261 = vmatpush3.bf16.msra.mxu1 %v1494_v49  ;;  %v1274_v49 = vpack.c.bf16 %v712_v44, %v711_v36 }
 0x3fc   :  { %1263 = vmatprep.subr.bf16.mxu1 %v1497_v51 }
 0x3fd   :  { %1275 = vmatprep.subr.bf16.mxu0 %v1274_v49 }
 0x3fe   :  { %1277 = vmatpush3.bf16.msra.mxu0 %v1274_v49 }
 0x3ff   :  { %1265 = vmatpush3.bf16.msra.mxu1 %v1497_v51  ;;  %v713_v51 = vld [vmem:[%s1675_s3 + $0x20] sm:$0xff] }
 0x400   :  { %1267 = vmatprep.subr.bf16.mxu1 %v1499_v53 }
 0x403   :  { %1269 = vmatpush3.bf16.msra.mxu1 %v1499_v53  ;;  %v714_v53 = vld [vmem:[%s1675_s3 + $0x28] sm:$0xff]  ;;  %s1338_s3 = smov 124  }
 0x404   :  { %v1278_v26 = vpack.c.bf16 %v714_v53, %v713_v51 }
 0x406   :  { %1279 = vmatprep.subr.bf16.mxu0 %v1278_v26 }
 0x407   :  { %1281 = vmatpush3.bf16.msra.mxu0 %v1278_v26 }
 0x408   :  { %1283 = vmatprep.subr.bf16.mxu0 %v1282_v33 }
 0x40b   :  { %1285 = vmatpush3.bf16.msra.mxu0 %v1282_v33 }
 0x4b9   :  { %v1140_v27 = vpop.f32.mrb[4].mxu1 }
 0x4ba   :  { %v582_v28 = vpop.f32.mrb[5].mxu1  ;;  %v592_v30 = vmul.f32 %v1307_v19, %v1140_v27 }
 0x4bb   :  { %v591_v29 = vmul.f32 %v1305_v18, %v582_v28 }
 0x4bd   :  { %1173 = vmatprep.mubr.f32.mxu1 %v591_v29 }
 0x4be   :  { %1174 = vmatmul.mubr.f32.vlgmr.msra.gmra.mrb[6].mxu1 %v592_v30 }
 0x591   :  { %v1175_v39 = vpop.f32.mrb[6].mxu1 }
 0x592   :  { %v704_v40 = vadd.f32 %v1175_v39, %v1015_v38  ;;  %v698_v42 = vpop.f32.mrb[7].mxu1 }
 0x593   :  { %v699_v43 = vadd.f32 %v1015_v38, %v698_v42 }
 0x594   :  { %v708_v46 = vmax.f32 %v704_v40, 0.0 }
 0x595   :  { %v707_v45 = vmax.f32 %v699_v43, 0.0 }
 0x597   :  { %1192 = vmatprep.mubr.msk.f32.mxu0 %vm196_vm7, %v707_v45 }
 0x598   :  { %1193 = vmatmul.mubr.msk.f32.vlgmr.msra.gmra.mrb[4].mxu0 %vm196_vm7, %v708_v46 }
 0x66b   :  { %v1194_v47 = vpop.f32.mrb[4].mxu0 }
 0x66c   :  { %843 = vperm.xlu1 %1302, %v1194_v47   ;;  %v789_v48 = vpop.f32.mrb[5].mxu0 }
 0x66d   :  { %v1286_v50 = vpack.c.bf16 %v1194_v47, %v789_v48  ;;  %800 = vrot.lane.b32.xlu0 %v789_v48, %s1338_s3 }
 0x66f   :  { %1287 = vmatprep.subr.bf16.mxu1 %v1286_v50 }
 0x670   :  { %1289 = vmatpush3.bf16.msra.mxu1 %v1286_v50 }
 0x671   :  { %802 = vrot.lane.b32.xlu0 %v1194_v47, %s1338_s3 }
 0x675   :  { %839 = vperm.xlu0 %1303, %v789_v48  }
 0x6df   :  { %v801_v52 = vpop.permute.xlu0 %800 }
 0x6e0   :  { %806 = vxpose.xlu0.b32.start [1/2] (short) (narrow) %v801_v52, 8 }
 0x6e3   :  { %v803_v54 = vpop.permute.xlu0 %802 }
 0x6e4   :  { %807 = vxpose.xlu0.b32.end [2/2] (short) (narrow) %v803_v54, 8 }
 0x6eb   :  { %v844_v59 = vpop.permute.xlu1 %843 }
 0x6f4   :  { %v840_v55 = vpop.permute.xlu0 %839 }
 0x760   :  { %v822_v57 = vpop.trf.xlu0 }
 0x761   :  { %v849_v58 = vrot.slane %v822_v57, %v206_v62 }
 0x763   :  { %v850_v60 = vadd.f32 %v849_v58, %v840_v55  ;;  %v851_v61 = vadd.f32 %v849_v58, %v844_v59 }
 0x765   :  { %v854_v1 = vmul.f32 0.2, %v850_v60  ;;  %v855_v2 = vmul.f32 0.2, %v851_v61  ;;  %vm853_vm13 = vcmp.gt.f32.partialorder %v851_v61, 0.0  ;;  %vm852_vm14 = vcmp.gt.f32.partialorder %v850_v60, 0.0 }
 0x767   :  { %v857_v3 = vsel %vm853_vm13, %v851_v61, %v855_v2  ;;  %v856_v4 = vsel %vm852_vm14, %v850_v60, %v854_v1 }
 0x768   :  { %v861_v5 = vadd.f32 %v859_v63, %v857_v3  ;;  %v860_v56 = vadd.f32 %v858_v0, %v856_v4 }
 0x76a   :  { %v865_v62 = vsel %vm39_vm0, %v861_v5, -inf  ;;  %v862_v8 = vsel %vm39_vm0, %v860_v56, -inf }
 0x76b   :  { %866 = vmax.xlane.f32.xlu0 %v865_v62  ;;  %863 = vmax.xlane.f32.xlu1 %v862_v8 }
 0x7f8   :  { %v867_v9 = vpop.xlane.xlu0 %866  ;;  %v864_v10 = vpop.xlane.xlu1 %863 }
 0x7f9   :  { %v869_v11 = vsub.f32 %v861_v5, %v867_v9  ;;  %v868_v12 = vsub.f32 %v860_v56, %v864_v10 }
 0x7fb   :  { %v870_v13 = vmul.f32 1.442695, %v868_v12  ;;  %v872_v14 = vmul.f32 1.442695, %v869_v11 }
 0x7fd   :  { %1312 = vpow2.f32 %v870_v13 }
 0x7fe   :  { %1314 = vpow2.f32 %v872_v14 }
 0x807   :  { %v1313_v15 = vpop.eup %1312 }
 0x808   :  { %v874_v16 = vsel %vm39_vm0, %v1313_v15, 0.0  ;;  %v1315_v7 = vpop.eup %1314 }
 0x809   :  { %875 = vadd.xlane.f32.xlu1 %v874_v16  ;;  %v877_v17 = vsel %vm39_vm0, %v1315_v7, 0.0 }
 0x80d   :  { %878 = vadd.xlane.f32.xlu1 %v877_v17 }
 0x896   :  { %v876_v6 = vpop.xlane.xlu1 %875 }
 0x897   :  { %v880_v18 = vmax.f32 %v876_v6, 1e-30 }
 0x899   :  { %1316 = vrcp.f32 %v880_v18 }
 0x89a   :  { %v879_v19 = vpop.xlane.xlu1 %878 }
 0x89b   :  { %v881_v20 = vmax.f32 %v879_v19, 1e-30 }
 0x89d   :  { %1318 = vrcp.f32 %v881_v20 }
 0x8a3   :  { %v1317_v21 = vpop.eup %1316 }
 0x8a4   :  { %v884_v22 = vmul.f32 %v1317_v21, %v1313_v15 }
 0x8a6   :  { %1199 = vmatprep.mubr.msk.f32.mxu1 %vm39_vm0, %v884_v22 }
 0x8a7   :  { %v1319_v23 = vpop.eup %1318 }
 0x8a8   :  { %v885_v24 = vmul.f32 %v1319_v23, %v1315_v7 }
 0x8aa   :  { %1200 = vmatmul.mubr.msk.f32.vlgmr.msra.gmra.mrb[8].mxu1 %vm39_vm0, %v885_v24 }
 0x97d   :  { %v1201_v34 = vpop.f32.mrb[8].mxu1 }
 0x97e   :  { %v965_v35 = vpop.f32.mrb[9].mxu1  ;;  %v971_v41 = vadd.f32 %v1201_v34, %v1018_v25 }
 0x97f   :  { %v966_v36 = vadd.f32 %v1018_v25, %v965_v35 }
 0x980   :  { %v978_v49 = vsel %vm974_vm15, %v971_v41, -inf }
 0x981   :  { %v975_v44 = vsel %vm974_vm15, %v966_v36, -inf }
 0x982   :  { %976 = vmax.xlane.f32.xlu1 %v975_v44 }
 0x986   :  { %979 = vmax.xlane.f32.xlu1 %v978_v49 }
 0xa0f   :  { %v977_v51 = vpop.xlane.xlu1 %976 }
 0xa10   :  { %v981_v53 = vsub.f32 %v966_v36, %v977_v51 }
 0xa12   :  { %v983_v26 = vmul.f32 1.442695, %v981_v53 }
 0xa13   :  { %v980_v27 = vpop.xlane.xlu1 %979 }
 0xa14   :  { %1320 = vpow2.f32 %v983_v26  ;;  %v982_v28 = vsub.f32 %v971_v41, %v980_v27 }
 0xa16   :  { %v985_v29 = vmul.f32 1.442695, %v982_v28 }
 0xa18   :  { %1322 = vpow2.f32 %v985_v29 }
 0xa1e   :  { %v1321_v30 = vpop.eup %1320 }
 0xa1f   :  { %v987_v31 = vsel %vm974_vm15, %v1321_v30, 0.0 }
 0xa20   :  { %988 = vadd.xlane.f32.xlu0 %v987_v31 }
 0xa22   :  { %v1323_v32 = vpop.eup %1322 }
 0xa23   :  { %v990_v33 = vsel %vm974_vm15, %v1323_v32, 0.0 }
 0xa24   :  { %991 = vadd.xlane.f32.xlu1 %v990_v33 }
 0xaad   :  { %v989_v37 = vpop.xlane.xlu0 %988 }
 0xaae   :  { %1324 = vlog2.f32 %v989_v37 }
 0xab1   :  { %v992_v38 = vpop.xlane.xlu1 %991 }
 0xab2   :  { %1326 = vlog2.f32 %v992_v38 }
 0xab8   :  { %v1325_v39 = vpop.eup %1324 }
 0xab9   :  { %v994_v40 = vmul.f32 0.6931472, %v1325_v39 }
 0xabb   :  { %v997_v42 = vsub.f32 %v981_v53, %v994_v40 }
 0xabc   :  { %v1327_v43 = vpop.eup %1326 }
 0xabd   :  { %v999_v45 = vsel %vm974_vm15, %v997_v42, 0.0  ;;  %v996_v46 = vmul.f32 0.6931472, %v1327_v43 }
 0xabe   :  { %1001 = vst [vmem:[%s1679_s10] sm:$0xff] %v999_v45 }
 0xabf   :  { %v998_v47 = vsub.f32 %v982_v28, %v996_v46 }
 0xac1   :  { %v1000_v48 = vsel %vm974_vm15, %v998_v47, 0.0 }
 0xac2   :  { %1002 = vst [vmem:[%s1679_s10 + $0x8] sm:$0xff] %v1000_v48 }

</bundles_post_ra>
